<compile_context>
chip_gen: v5e
topology: v5e:2x2
jax: 0.10.0
libtpu: 0.0.40
codegen_flags: <defaults>
</compile_context>

<pallas_src>
import jax
import jax.numpy as jnp
from jax.experimental import pallas as pl
from jax.experimental.pallas import tpu as pltpu


def highway_kernel(x_ref, w_ref, b_ref, o_ref):
    half = x_ref.shape[-1]                       # L = pack * e_word lanes
    x = x_ref[...]

    # Single fused MXU matmul -> (tile_rows, 2L); one broadcast bias add.
    y = jnp.dot(x, w_ref[...], preferred_element_type=jnp.float32)
    y = y + b_ref[...].astype(jnp.float32)

    proj = jnp.maximum(y[:, :half], 0.0)         # relu branch   (VPU)
    gate = jax.nn.sigmoid(y[:, half:])           # sigmoid branch (EUP)

    xf = x.astype(jnp.float32)
    # out = gate*proj + (1-gate)*x  ==  x + gate*(proj - x)
    o_ref[...] = (xf + gate * (proj - xf)).astype(o_ref.dtype)


def highway_forward(x, w_proj, b_proj, w_gate, b_gate, *, tile_n=512):
    """Highway forward (eval-mode dropout).

    x:      (N, E)
    w_proj: (E, E) stored as (in, out)  (= PyTorch weight.T)
    b_proj: (E,)
    w_gate: (E, E) stored as (in, out)
    b_gate: (E,)
    """
    n, e = x.shape
    out_dtype = x.dtype

    # ---- lane packing: put `pack` consecutive rows across the 128 lanes ----
    pack = 128 // e if (e < 128 and 128 % e == 0) else 1
    lanes = pack * e                               # L

    if pack > 1:
        eye = jnp.eye(pack, dtype=w_proj.dtype)
        wp = jnp.kron(eye, w_proj)                 # (L, L) block-diagonal
        wg = jnp.kron(eye, w_gate)
        bp = jnp.tile(b_proj, pack)
        bg = jnp.tile(b_gate, pack)
    else:
        wp, wg, bp, bg = w_proj, w_gate, b_proj, b_gate

    w_fused = jnp.concatenate([wp, wg], axis=1)                 # (L, 2L)
    b_fused = jnp.concatenate([bp, bg]).reshape(1, 2 * lanes)   # (1, 2L)

    # Pack rows: (N, E) -> (n_pack, L); pad N up to a multiple of `pack`.
    n_pack = pl.cdiv(n, pack)
    row_pad = n_pack * pack - n
    xp = jnp.pad(x, ((0, row_pad), (0, 0))) if row_pad else x
    xp = xp.reshape(n_pack, lanes)

    # Row tiling over a real grid (double-buffered HBM<->VMEM pipeline).
    if n_pack <= tile_n:
        tile_rows = n_pack                 # single block == full array (legal)
        grid_n = 1
    else:
        tile_rows = max(8, (tile_n // 8) * 8)   # keep sublane dim %8 == 0
        grid_n = pl.cdiv(n_pack, tile_rows)
        pad = grid_n * tile_rows - n_pack
        if pad:
            xp = jnp.pad(xp, ((0, pad), (0, 0)))

    out_packed = pl.pallas_call(
        highway_kernel,
        out_shape=jax.ShapeDtypeStruct((grid_n * tile_rows, lanes), out_dtype),
        grid_spec=pltpu.PrefetchScalarGridSpec(
            num_scalar_prefetch=0,
            grid=(grid_n,),
            in_specs=[
                pl.BlockSpec((tile_rows, lanes), lambda i: (i, 0)),   # x tile
                pl.BlockSpec((lanes, 2 * lanes), lambda i: (0, 0)),   # fused W (resident)
                pl.BlockSpec((1, 2 * lanes), lambda i: (0, 0)),       # fused bias (resident)
            ],
            out_specs=pl.BlockSpec((tile_rows, lanes), lambda i: (i, 0)),
        ),
        compiler_params=pltpu.CompilerParams(
            dimension_semantics=("parallel",),      # shard row tiles across TCs (v7x)
        ),
    )(xp, w_fused, b_fused)

    # Unpack: drop grid padding, undo lane packing, drop row padding.
    out = out_packed[:n_pack].reshape(n_pack * pack, e)[:n]
    return out


def highway_ref(x, w_proj, b_proj, w_gate, b_gate):
    proj = jax.nn.relu(x @ w_proj + b_proj)
    gate = jax.nn.sigmoid(x @ w_gate + b_gate)
    return gate * proj + (1.0 - gate) * x


if __name__ == "__main__":
    e_word = 32          # hidden size of the highway layer
    batch = 8            # rows (e.g. batch * seq of char-CNN outputs)

    key = jax.random.PRNGKey(0)
    kx, kwp, kbp, kwg, kbg = jax.random.split(key, 5)

    x = jax.random.normal(kx, (batch, e_word), dtype=jnp.float32)
    # Deterministic parameter init (stored as (in, out), i.e. PyTorch W.T)
    w_proj = jax.random.normal(kwp, (e_word, e_word), dtype=jnp.float32) * 0.1
    b_proj = jax.random.normal(kbp, (e_word,), dtype=jnp.float32) * 0.1
    w_gate = jax.random.normal(kwg, (e_word, e_word), dtype=jnp.float32) * 0.1
    b_gate = jax.random.normal(kbg, (e_word,), dtype=jnp.float32) * 0.1

    out = highway_forward(x, w_proj, b_proj, w_gate, b_gate)
    out = jax.block_until_ready(out)
    ref = highway_ref(x, w_proj, b_proj, w_gate, b_gate)
    assert out.shape == (batch, e_word)
    assert jnp.allclose(out, ref, atol=1e-5, rtol=1e-5), "mismatch vs reference"

    # Larger case exercising multi-tile grid, lane packing, and padding paths.
    n_big = 1030  # not a multiple of pack (4) nor of the row tile
    x_big = jax.random.normal(kx, (n_big, e_word), dtype=jnp.float32)
    out_big = jax.block_until_ready(
        highway_forward(x_big, w_proj, b_proj, w_gate, b_gate, tile_n=64))
    ref_big = highway_ref(x_big, w_proj, b_proj, w_gate, b_gate)
    assert out_big.shape == (n_big, e_word)
    assert jnp.allclose(out_big, ref_big, atol=1e-5, rtol=1e-5), "mismatch (big)"

    print("KERNEL_OK")
</pallas_src>

<mosaic_0001>
module attributes {stable_mosaic.version = 11 : i64} {
  func.func @highway_kernel(%arg0: i32, %arg1: memref<2x128xf32, #tpu.memory_space<vmem>>, %arg2: memref<128x256xf32, #tpu.memory_space<vmem>>, %arg3: memref<1x256xf32, #tpu.memory_space<vmem>>, %arg4: memref<2x128xf32, #tpu.memory_space<vmem>>) attributes {dimension_semantics = [#tpu.dimension_semantics<parallel>], iteration_bounds = array<i64: 1>, scalar_prefetch = 0 : i64, scratch_operands = 0 : i64, tpu.core_type = #tpu.core_type<tc>, window_params = [{transform_indices = @transform_0, window_bounds = array<i64: 2, 128>}, {pipeline_mode = #tpu.pipeline_mode<synchronous>, transform_indices = @transform_1, window_bounds = array<i64: 128, 256>}, {pipeline_mode = #tpu.pipeline_mode<synchronous>, transform_indices = @transform_2, window_bounds = array<i64: 1, 256>}, {transform_indices = @transform_3, window_bounds = array<i64: 2, 128>}]} {
    %c0 = arith.constant 0 : index
    %c0_0 = arith.constant 0 : index
    %0 = vector.load %arg1[%c0, %c0_0] : memref<2x128xf32, #tpu.memory_space<vmem>>, vector<2x128xf32>
    %c0_1 = arith.constant 0 : index
    %c0_2 = arith.constant 0 : index
    %1 = vector.load %arg2[%c0_1, %c0_2] : memref<128x256xf32, #tpu.memory_space<vmem>>, vector<128x256xf32>
    %cst = arith.constant dense<0.000000e+00> : vector<2x256xf32>
    %2 = tpu.matmul %0, %1, %cst {dimension_numbers = #tpu.dot_dimension_numbers<[1], [0], [0], [1], [0, 0, 1, 1], [], []>} : vector<2x128xf32>, vector<128x256xf32>, vector<2x256xf32> -> vector<2x256xf32>
    %c0_3 = arith.constant 0 : index
    %c0_4 = arith.constant 0 : index
    %3 = vector.load %arg3[%c0_3, %c0_4] : memref<1x256xf32, #tpu.memory_space<vmem>>, vector<1x256xf32>
    %4 = vector.broadcast %3 : vector<1x256xf32> to vector<2x256xf32>
    %5 = arith.addf %2, %4 : vector<2x256xf32>
    %6 = vector.extract_strided_slice %5 {offsets = [0, 0], sizes = [2, 128], strides = [1, 1]} : vector<2x256xf32> to vector<2x128xf32>
    %cst_5 = arith.constant 0.000000e+00 : f32
    %7 = vector.broadcast %cst_5 : f32 to vector<2x128xf32>
    %8 = arith.maximumf %6, %7 : vector<2x128xf32>
    %9 = vector.extract_strided_slice %5 {offsets = [0, 128], sizes = [2, 128], strides = [1, 1]} : vector<2x256xf32> to vector<2x128xf32>
    %10 = arith.negf %9 : vector<2x128xf32>
    %11 = math.exp %10 : vector<2x128xf32>
    %cst_6 = arith.constant 1.000000e+00 : f32
    %12 = vector.broadcast %cst_6 : f32 to vector<2x128xf32>
    %13 = arith.addf %12, %11 : vector<2x128xf32>
    %14 = arith.divf %12, %13 : vector<2x128xf32>
    %15 = arith.subf %8, %0 : vector<2x128xf32>
    %16 = arith.mulf %14, %15 : vector<2x128xf32>
    %17 = arith.addf %0, %16 : vector<2x128xf32>
    %c0_7 = arith.constant 0 : index
    %c0_8 = arith.constant 0 : index
    %18 = vector.load %arg4[%c0_7, %c0_8] : memref<2x128xf32, #tpu.memory_space<vmem>>, vector<2x128xf32>
    tpu.vector_store %arg4[%c0_7, %c0_8], %17 {strides = array<i32>} : memref<2x128xf32, #tpu.memory_space<vmem>>, vector<2x128xf32>,
    return
  }
  func.func @transform_0(%arg0: i32) -> (i32, i32) {
    %c0_i32 = arith.constant 0 : i32
    %c0_i32_0 = arith.constant 0 : i32
    return %arg0, %c0_i32 : i32, i32
  }
  func.func @transform_1(%arg0: i32) -> (i32, i32) {
    %c0_i32 = arith.constant 0 : i32
    %c0_i32_0 = arith.constant 0 : i32
    %c0_i32_1 = arith.constant 0 : i32
    return %c0_i32, %c0_i32_0 : i32, i32
  }
  func.func @transform_2(%arg0: i32) -> (i32, i32) {
    %c0_i32 = arith.constant 0 : i32
    %c0_i32_0 = arith.constant 0 : i32
    %c0_i32_1 = arith.constant 0 : i32
    return %c0_i32, %c0_i32_0 : i32, i32
  }
  func.func @transform_3(%arg0: i32) -> (i32, i32) {
    %c0_i32 = arith.constant 0 : i32
    %c0_i32_0 = arith.constant 0 : i32
    return %arg0, %c0_i32 : i32, i32
  }
}

</mosaic_0001>

<bundles_post_ra>
// kernel: tpu_custom_call.1
= control target key start
LH: loop header
LB: loop body
LE: loop exit
PB: predicated region body
PF: predicated region fallthrough
CT: control target
= control target key end

     0   :  { %8 = vsyncpa [#allocation3], 0  ;;  %s330_s0 = inlined_call_operand.hbm [shape: f32[2,128], index: 0, kind: input, shape index: {}]   ;;  %s331_s1 = inlined_call_operand.hbm [shape: f32[128,256], index: 1, kind: input, shape index: {}]   ;;  %s332_s2 = inlined_call_operand.hbm [shape: f32[1,256], index: 2, kind: input, shape index: {}]   ;;  %s333_s3 = inlined_call_operand.hbm [shape: f32[2,128], index: 3, kind: output, shape index: {}]  }
   0x1   :  { %9 = vsyncpa [#allocation6], 0  ;;  %s26_s14 = sshll.u32 %s331_s1, 4  ;;  %s27_s14 = int_to_ptr.hbm [resolvable:$true] %s26_s14 }
   0x2   :  { %10 = vsyncpa [#allocation4], 0  ;;  %s292_s15 = smov [#allocation5]   ;;  %s16_s19 = sshll.u32 %s330_s0, 4  ;;  %s17_s19 = int_to_ptr.hbm [resolvable:$true] %s16_s19 }
   0x3   :  { %s28_s16 = sshll.u32 %s292_s15, 4  ;;  %s293_s20 = smov 256   ;;  %s29_s16 = int_to_ptr.vmem [resolvable:$true] %s28_s16 }
   0x4   :  { %s294_s21 = smov 16   ;;  %s295_s22 = smov [#allocation2]  }
   0x5   :  { %34 = dma.hbm_to_vmem [thread:$0]  %s27_s14, 4096, %s29_s16, [#allocation6], %s293_s20, %s293_s20, %s294_s21  }
   0x6   :  { %s18_s23 = sshll.u32 %s295_s22, 4  ;;  %s40_s26 = sshll.u32 %s332_s2, 4  ;;  %s19_s23 = int_to_ptr.vmem [resolvable:$true] %s18_s23  ;;  %s41_s26 = int_to_ptr.hbm [resolvable:$true] %s40_s26 }
   0x7   :  { %21 = dma.hbm_to_vmem [thread:$0]  %s17_s19, 32, %s19_s23, [#allocation3]  }
   0x8   :  { %s296_s1 = smov [#allocation7]  }
   0x9   :  { %s42_s27 = sshll.u32 %s296_s1, 4  ;;  %s43_s27 = int_to_ptr.vmem [resolvable:$true] %s42_s27 }
   0xa   :  { %45 = dma.hbm_to_vmem [thread:$0]  %s41_s26, 32, %s43_s27, [#allocation6]  }
   0xb   :  { %286 = dma.done.wait [#allocation3], 32  }
   0xc   :  { %287 = vsyncadd [#allocation3], 4294967264 }
   0xd   :  { %288 = dma.done.wait [#allocation6], 4128  }
   0xe   :  { %289 = vsyncadd [#allocation6], 4294963168  ;;  %v90_v0 = vld [vmem:[#allocation5 + $0xf8] sm:$0xff]  ;;  %v88_v1 = vld [vmem:[#allocation5 + $0xe8] sm:$0xff]  ;;  %s297_s0 = smov [#allocation8]   ;;  %s168_s30 = sshll.u32 %s333_s3, 4  ;;  %s169_s30 = int_to_ptr.hbm [resolvable:$true] %s168_s30 }
   0xf   :  { %117 = vmatpush.msra.mxu1 %v90_v0  ;;  %v86_v2 = vld [vmem:[#allocation5 + $0xd8] sm:$0xff]  ;;  %v84_v3 = vld [vmem:[#allocation5 + $0xc8] sm:$0xff]  ;;  %v89_v4 = vld [vmem:[#allocation5 + $0xf0] sm:$0xff]  ;;  %s166_s2 = sshll.u32 %s297_s0, 4  ;;  %s167_s2 = int_to_ptr.vmem [resolvable:$true] %s166_s2 }
  0x10   :  { %v87_v5 = vld [vmem:[#allocation5 + $0xe0] sm:$0xff]  ;;  %97 = vmatpush.msra.mxu0 %v89_v4  ;;  %v82_v6 = vld [vmem:[#allocation5 + $0xb8] sm:$0xff]  ;;  %v85_v7 = vld [vmem:[#allocation5 + $0xd0] sm:$0xff] }
  0x11   :  { %118 = vmatpush.msra.mxu1 %v88_v1  ;;  %v80_v8 = vld [vmem:[#allocation5 + $0xa8] sm:$0xff]  ;;  %v83_v9 = vld [vmem:[#allocation5 + $0xc0] sm:$0xff]  ;;  %v78_v10 = vld [vmem:[#allocation5 + $0x98] sm:$0xff] }
  0x12   :  { %98 = vmatpush.msra.mxu0 %v87_v5  ;;  %v81_v11 = vld [vmem:[#allocation5 + $0xb0] sm:$0xff]  ;;  %v76_v12 = vld [vmem:[#allocation5 + $0x88] sm:$0xff]  ;;  %v79_v13 = vld [vmem:[#allocation5 + $0xa0] sm:$0xff] }
  0x13   :  { %119 = vmatpush.msra.mxu1 %v86_v2  ;;  %v74_v14 = vld [vmem:[#allocation5 + $0x78] sm:$0xff]  ;;  %v77_v15 = vld [vmem:[#allocation5 + $0x90] sm:$0xff]  ;;  %v72_v16 = vld [vmem:[#allocation5 + $0x68] sm:$0xff] }
  0x14   :  { %99 = vmatpush.msra.mxu0 %v85_v7  ;;  %v75_v17 = vld [vmem:[#allocation5 + $0x80] sm:$0xff]  ;;  %v70_v18 = vld [vmem:[#allocation5 + $0x58] sm:$0xff]  ;;  %v73_v19 = vld [vmem:[#allocation5 + $0x70] sm:$0xff] }
  0x15   :  { %120 = vmatpush.msra.mxu1 %v84_v3  ;;  %v68_v20 = vld [vmem:[#allocation5 + $0x48] sm:$0xff]  ;;  %v71_v21 = vld [vmem:[#allocation5 + $0x60] sm:$0xff]  ;;  %v66_v22 = vld [vmem:[#allocation5 + $0x38] sm:$0xff] }
  0x16   :  { %100 = vmatpush.msra.mxu0 %v83_v9  ;;  %v69_v23 = vld [vmem:[#allocation5 + $0x50] sm:$0xff]  ;;  %v64_v24 = vld [vmem:[#allocation5 + $0x28] sm:$0xff]  ;;  %v67_v25 = vld [vmem:[#allocation5 + $0x40] sm:$0xff] }
  0x17   :  { %121 = vmatpush.msra.mxu1 %v82_v6  ;;  %v62_v26 = vld [vmem:[#allocation5 + $0x18] sm:$0xff]  ;;  %v65_v27 = vld [vmem:[#allocation5 + $0x30] sm:$0xff]  ;;  %v60_v28 = vld [vmem:[#allocation5 + $0x8] sm:$0xff] }
  0x18   :  { %101 = vmatpush.msra.mxu0 %v81_v11  ;;  %v63_v29 = vld [vmem:[#allocation5 + $0x20] sm:$0xff]  ;;  %v58_v30 = vld [vmem:[#allocation2] sm:$0x3]  ;;  %v61_v31 = vld [vmem:[#allocation5 + $0x10] sm:$0xff] }
  0x19   :  { %122 = vmatpush.msra.mxu1 %v80_v8  ;;  %v59_v32 = vld [vmem:[#allocation5] sm:$0xff] }
  0x1a   :  { %102 = vmatpush.msra.mxu0 %v79_v13  ;;  %v91_v33 = vld [vmem:[#allocation7] sm:$0x3] }
  0x1b   :  { %123 = vmatpush.msra.mxu1 %v78_v10  ;;  %v94_v34 = vperm.slane %v91_v33, 1  ;;  %v93_v40 = vperm.slane %v91_v33, 0 }
  0x1c   :  { %103 = vmatpush.msra.mxu0 %v77_v15 }
  0x1d   :  { %124 = vmatpush.msra.mxu1 %v76_v12 }
  0x1e   :  { %104 = vmatpush.msra.mxu0 %v75_v17 }
  0x1f   :  { %125 = vmatpush.msra.mxu1 %v74_v14 }
  0x20   :  { %105 = vmatpush.msra.mxu0 %v73_v19 }
  0x21   :  { %126 = vmatpush.msra.mxu1 %v72_v16 }
  0x22   :  { %106 = vmatpush.msra.mxu0 %v71_v21 }
  0x23   :  { %127 = vmatpush.msra.mxu1 %v70_v18 }
  0x24   :  { %107 = vmatpush.msra.mxu0 %v69_v23 }
  0x25   :  { %128 = vmatpush.msra.mxu1 %v68_v20 }
  0x26   :  { %108 = vmatpush.msra.mxu0 %v67_v25 }
  0x27   :  { %129 = vmatpush.msra.mxu1 %v66_v22 }
  0x28   :  { %109 = vmatpush.msra.mxu0 %v65_v27 }
  0x29   :  { %130 = vmatpush.msra.mxu1 %v64_v24 }
  0x2a   :  { %110 = vmatpush.msra.mxu0 %v63_v29 }
  0x2b   :  { %131 = vmatpush.msra.mxu1 %v62_v26 }
  0x2c   :  { %111 = vmatpush.msra.mxu0 %v61_v31 }
  0x2d   :  { %132 = vmatpush.msra.mxu1 %v60_v28 }
  0x2e   :  { %133 = vmatmul.f32.vlgmr.msra.gmra.mxu1 %v58_v30  ;;  %112 = vmatpush.msra.mxu0 %v59_v32 }
  0x2f   :  { %113 = vmatmul.f32.vlgmr.msra.gmra.mxu0 %v58_v30 }
  0xab   :  { %v134_v35 = vpop.f32.mrf.mxu1 }
  0xac   :  { %v135_v36 = vadd.f32 %v134_v35, %v94_v34  ;;  %v114_v41 = vpop.f32.mrf.mxu0 }
  0xad   :  { %v115_v42 = vadd.f32 %v114_v41, %v93_v40 }
  0xae   :  { %v179_v37 = vmul.f32 -1.442695, %v135_v36 }
  0xaf   :  { %v137_v46 = vmax.f32 %v115_v42, 0.0 }
  0xb0   :  { %186 = vpow2.f32 %v179_v37 }
  0xb1   :  { %v157_v51 = vsub.f32 %v137_v46, %v58_v30 }
  0xb6   :  { %v187_v38 = vpop.eup %186 }
  0xb7   :  { %v141_v39 = vadd.f32 1.0, %v187_v38 }
  0xb9   :  { %188 = vrcp.f32 %v141_v39  ;;  %v153_v47 = vand.u32 2147483648, %v141_v39  ;;  %v151_v49 = vand.u32 2147483647, %v141_v39  ;;  %vm147_vm1 = vweird.f32 %v141_v39 }
  0xbb   :  { %v154_v52 = vor.u32 1.1754944e-38, %v153_v47  ;;  %vm152_vm3 = vcmp.eq.f32.partialorder %v151_v49, 8.507059e+37 }
  0xbf   :  { %v189_v43 = vpop.eup %188 }
  0xc0   :  { %v143_v44 = vmul.f32 %v189_v43, %v141_v39  ;;  %vm148_vm0 = vweird.f32 %v189_v43 }
  0xc1   :  { %vm149_vm2 = vmor %vm147_vm1, %vm148_vm0 }
  0xc2   :  { %v144_v45 = vsub.f32 1.0, %v143_v44 }
  0xc4   :  { %v145_v48 = vmul.f32 %v189_v43, %v144_v45 }
  0xc6   :  { %v146_v50 = vadd.f32 %v189_v43, %v145_v48 }
  0xc8   :  { %v150_v53 = vsel %vm149_vm2, %v189_v43, %v146_v50 }
  0xc9   :  { %v155_v54 = vsel %vm152_vm3, %v154_v52, %v150_v53 }
  0xca   :  { %v158_v55 = vmul.f32 %v157_v51, %v155_v54 }
  0xcc   :  { %v159_v56 = vadd.f32 %v158_v55, %v58_v30 }
  0xce   :  { %160 = vst [vmem:[#allocation8] sm:$0x3] %v159_v56 }
  0xcf   :  { %171 = dma.vmem_to_hbm [thread:$0]  %s167_s2, 32, %s169_s30, [#allocation4]  }
  0xd0   :  { %290 = dma.done.wait [#allocation4], 32  }
  0xd1   :  { %291 = vsyncadd [#allocation4], 4294967264 }
  0xd2   :  { %176 = vsyncpa [#allocation3], 1 }
  0xd3   :  { %177 = vsyncpa [#allocation6], 1 }
  0xd4   :  { %178 = vsyncpa [#allocation4], 1 }

</bundles_post_ra>
